<compile_context>
chip_gen: v7x
topology: tpu7x:2x2x1
jax: 0.10.0
libtpu: 0.0.40
codegen_flags: <defaults>
</compile_context>

<pallas_src>
import jax
import jax.numpy as jnp
from jax.experimental import pallas as pl
from jax.experimental.pallas import tpu as pltpu

LANES = 128
EPS = 1e-5
VMEM_LIMIT = 64 * 1024 * 1024  # explicit; tiles are sized well below this


def _round_up(x, m):
    return (x + m - 1) // m * m


# ----------------------------- Pallas kernels -----------------------------

def conv_stats_kernel(p_ref, w_ref, o_ref, sum_ref, ssq_ref):
    # p_ref: (TM, Kp) bf16, w_ref: (Kp, Cp) bf16 -> f32 accumulation on MXU.
    y = jnp.dot(p_ref[...], w_ref[...], preferred_element_type=jnp.float32)
    o_ref[...] = y
    # Per-tile partial batch statistics (fused epilogue, avoids re-reading y).
    s = jnp.sum(y, axis=0, keepdims=True)        # (1, Cp)
    q = jnp.sum(y * y, axis=0, keepdims=True)    # (1, Cp)
    sum_ref[...] = jnp.broadcast_to(s[:, None, :], sum_ref.shape)
    ssq_ref[...] = jnp.broadcast_to(q[:, None, :], ssq_ref.shape)


def bn_relu_kernel(x_ref, scale_ref, shift_ref, o_ref):
    # (x - mean) * gamma / sqrt(var+eps) + beta  ==  x*scale + shift
    y = x_ref[...] * scale_ref[...] + shift_ref[...]
    o_ref[...] = jnp.maximum(y, 0.0).astype(o_ref.dtype)


def pallas_conv_stats(patches, w, tm):
    Mp, Kp = patches.shape
    Cp = w.shape[1]
    nt = Mp // tm
    out_shape = (
        jax.ShapeDtypeStruct((Mp, Cp), jnp.float32),
        jax.ShapeDtypeStruct((nt, 8, Cp), jnp.float32),
        jax.ShapeDtypeStruct((nt, 8, Cp), jnp.float32),
    )
    y, sums, ssqs = pl.pallas_call(
        conv_stats_kernel,
        out_shape=out_shape,
        grid=(nt,),
        in_specs=[
            pl.BlockSpec((tm, Kp), lambda i: (i, 0)),
            pl.BlockSpec((Kp, Cp), lambda i: (0, 0)),
        ],
        out_specs=(
            pl.BlockSpec((tm, Cp), lambda i: (i, 0)),
            pl.BlockSpec((1, 8, Cp), lambda i: (i, 0, 0)),
            pl.BlockSpec((1, 8, Cp), lambda i: (i, 0, 0)),
        ),
        compiler_params=pltpu.CompilerParams(
            dimension_semantics=("parallel",),
            vmem_limit_bytes=VMEM_LIMIT,
        ),
    )(patches, w)
    return y, sums[:, 0, :], ssqs[:, 0, :]


def pallas_bn_relu(x, scale, shift, tm, out_dtype):
    Mp, Cp = x.shape
    nt = Mp // tm
    return pl.pallas_call(
        bn_relu_kernel,
        out_shape=jax.ShapeDtypeStruct((Mp, Cp), out_dtype),
        grid=(nt,),
        in_specs=[
            pl.BlockSpec((tm, Cp), lambda i: (i, 0)),
            pl.BlockSpec((1, Cp), lambda i: (0, 0)),
            pl.BlockSpec((1, Cp), lambda i: (0, 0)),
        ],
        out_specs=pl.BlockSpec((tm, Cp), lambda i: (i, 0)),
        compiler_params=pltpu.CompilerParams(
            dimension_semantics=("parallel",),
            vmem_limit_bytes=VMEM_LIMIT,
        ),
    )(x, scale, shift)


# ------------------------------- JAX glue ---------------------------------

def im2col(x_nhwc, stride):
    """3x3 patches with padding=1. Returns ((M, 9*C), Ho, Wo)."""
    N, H, W, C = x_nhwc.shape
    xp = jnp.pad(x_nhwc, ((0, 0), (1, 1), (1, 1), (0, 0)))
    Ho = (H + 2 - 3) // stride + 1
    Wo = (W + 2 - 3) // stride + 1
    taps = []
    for dh in range(3):
        for dw in range(3):
            taps.append(
                xp[:, dh:dh + stride * Ho:stride, dw:dw + stride * Wo:stride, :]
            )
    p = jnp.stack(taps, axis=-2)                 # (N, Ho, Wo, 9, C)
    return p.reshape(N * Ho * Wo, 9 * C), Ho, Wo


def conv_bn_relu_stage(x_nhwc, w_pad, gamma_pad, beta_pad, stride, out_dtype):
    """Conv2d(3x3, pad=1, stride) -> BN(batch stats) -> ReLU, padded layout."""
    N = x_nhwc.shape[0]
    patches, Ho, Wo = im2col(x_nhwc, stride)
    M, K = patches.shape
    Kp = w_pad.shape[0]

    tm = min(512, _round_up(M, 8))
    Mp = _round_up(M, tm)
    # bf16 matmul operands; zero-padded rows/cols contribute nothing.
    patches = jnp.pad(patches.astype(jnp.bfloat16), ((0, Mp - M), (0, Kp - K)))

    y_raw, sums, ssqs = pallas_conv_stats(patches, w_pad, tm)

    # Global batch statistics from per-tile partials (divide by true M; the
    # zero-padded rows contribute exactly zero to the partial sums).
    inv_m = 1.0 / float(M)
    mean = sums.sum(axis=0, keepdims=True) * inv_m                      # (1, Cp)
    var = jnp.maximum(ssqs.sum(axis=0, keepdims=True) * inv_m - mean * mean, 0.0)
    inv_std = jax.lax.rsqrt(var + EPS)
    scale = gamma_pad * inv_std          # gamma=0 on padded channels -> stay 0
    shift = beta_pad - mean * scale

    y = pallas_bn_relu(y_raw, scale, shift, tm, out_dtype)
    return y, M, Ho, Wo


def xavier_uniform_conv(key, cout, cin, kh, kw):
    fan_in = cin * kh * kw
    fan_out = cout * kh * kw
    bound = (6.0 / (fan_in + fan_out)) ** 0.5
    return jax.random.uniform(key, (cout, cin, kh, kw), jnp.float32, -bound, bound)


def conv_weight_to_matmul(w_oihw):
    # (Cout, Cin, kh, kw) -> (kh*kw*Cin, Cout), matching im2col tap ordering.
    return jnp.transpose(w_oihw, (2, 3, 1, 0)).reshape(-1, w_oihw.shape[0])


def pad_weight(w_km):
    K, C = w_km.shape
    Kp, Cp = _round_up(K, LANES), _round_up(C, LANES)
    return jnp.pad(w_km, ((0, Kp - K), (0, Cp - C))).astype(jnp.bfloat16)


def pad_channel(v_1c):
    C = v_1c.shape[1]
    return jnp.pad(v_1c, ((0, 0), (0, _round_up(C, LANES) - C)))


def init_down_s_params(key, in_channels, out_channels):
    mid = out_channels  # DoubleConv: mid_channels defaults to out_channels
    k1, k2 = jax.random.split(key)
    w1 = xavier_uniform_conv(k1, mid, in_channels, 3, 3)
    w2 = xavier_uniform_conv(k2, out_channels, mid, 3, 3)
    # Conv biases (filled with 0.01 in PyTorch) are cancelled exactly by the
    # batch-stat mean subtraction of the following BatchNorm -> omitted.
    return {
        "w1": pad_weight(conv_weight_to_matmul(w1)),
        "g1": pad_channel(jnp.ones((1, mid), jnp.float32)),
        "beta1": pad_channel(jnp.zeros((1, mid), jnp.float32)),
        "c1": mid,
        "w2": pad_weight(conv_weight_to_matmul(w2)),
        "g2": pad_channel(jnp.ones((1, out_channels), jnp.float32)),
        "beta2": pad_channel(jnp.zeros((1, out_channels), jnp.float32)),
        "c2": out_channels,
    }


def down_s_forward(x_nchw, params):
    x = jnp.transpose(x_nchw, (0, 2, 3, 1)).astype(jnp.float32)  # NHWC
    N = x.shape[0]

    # Conv(3x3, s=2, p=1) -> BN -> ReLU ; intermediate kept bf16 (feeds bf16 matmul)
    y1, M1, Ho, Wo = conv_bn_relu_stage(
        x, params["w1"], params["g1"], params["beta1"], stride=2,
        out_dtype=jnp.bfloat16)
    x2 = y1[:M1, :params["c1"]].reshape(N, Ho, Wo, params["c1"])

    # Conv(3x3, s=1, p=1) -> BN -> ReLU ; final output f32
    y2, M2, Ho2, Wo2 = conv_bn_relu_stage(
        x2, params["w2"], params["g2"], params["beta2"], stride=1,
        out_dtype=jnp.float32)
    out = y2[:M2, :params["c2"]].reshape(N, Ho2, Wo2, params["c2"])

    return jnp.transpose(out, (0, 3, 1, 2))  # back to NCHW


if __name__ == "__main__":
    key = jax.random.PRNGKey(0)
    kx, kp = jax.random.split(key)

    in_channels, out_channels = 4, 8
    x = jax.random.normal(kx, (2, in_channels, 16, 16), jnp.float32)  # NCHW
    params = init_down_s_params(kp, in_channels, out_channels)

    fwd = jax.jit(lambda a: down_s_forward(a, params))
    out = jax.block_until_ready(fwd(x))

    assert out.shape == (2, out_channels, 8, 8), out.shape
    assert bool(jnp.all(jnp.isfinite(out)))
    print("KERNEL_OK")
</pallas_src>

<mosaic_0001>
module attributes {stable_mosaic.version = 11 : i64} {
  func.func @conv_stats_kernel(%arg0: i32, %arg1: memref<128x128xbf16, #tpu.memory_space<vmem>>, %arg2: memref<128x128xbf16, #tpu.memory_space<vmem>>, %arg3: memref<128x128xf32, #tpu.memory_space<vmem>>, %arg4: memref<1x8x128xf32, #tpu.memory_space<vmem>>, %arg5: memref<1x8x128xf32, #tpu.memory_space<vmem>>) attributes {dimension_semantics = [#tpu.dimension_semantics<parallel>], iteration_bounds = array<i64: 1>, scalar_prefetch = 0 : i64, scratch_operands = 0 : i64, tpu.core_type = #tpu.core_type<tc>, window_params = [{transform_indices = @transform_0, window_bounds = array<i64: 128, 128>}, {pipeline_mode = #tpu.pipeline_mode<synchronous>, transform_indices = @transform_1, window_bounds = array<i64: 128, 128>}, {transform_indices = @transform_2, window_bounds = array<i64: 128, 128>}, {transform_indices = @transform_3, window_bounds = array<i64: 1, 8, 128>}, {transform_indices = @transform_4, window_bounds = array<i64: 1, 8, 128>}]} {
    %c0 = arith.constant 0 : index
    %c0_0 = arith.constant 0 : index
    %0 = vector.load %arg1[%c0, %c0_0] : memref<128x128xbf16, #tpu.memory_space<vmem>>, vector<128x128xbf16>
    %c0_1 = arith.constant 0 : index
    %c0_2 = arith.constant 0 : index
    %1 = vector.load %arg2[%c0_1, %c0_2] : memref<128x128xbf16, #tpu.memory_space<vmem>>, vector<128x128xbf16>
    %cst = arith.constant dense<0.000000e+00> : vector<128x128xf32>
    %2 = tpu.matmul %0, %1, %cst {dimension_numbers = #tpu.dot_dimension_numbers<[1], [0], [0], [1], [0, 0, 1, 1], [], []>} : vector<128x128xbf16>, vector<128x128xbf16>, vector<128x128xf32> -> vector<128x128xf32>
    %c0_3 = arith.constant 0 : index
    %c0_4 = arith.constant 0 : index
    %3 = vector.load %arg3[%c0_3, %c0_4] : memref<128x128xf32, #tpu.memory_space<vmem>>, vector<128x128xf32>
    tpu.vector_store %arg3[%c0_3, %c0_4], %2 {strides = array<i32>} : memref<128x128xf32, #tpu.memory_space<vmem>>, vector<128x128xf32>,
    %cst_5 = arith.constant dense<0.000000e+00> : vector<128xf32>
    %4 = vector.multi_reduction <add>, %2, %cst_5 [0] : vector<128x128xf32> to vector<128xf32>
    %5 = vector.shape_cast %4 : vector<128xf32> to vector<1x128xf32>
    %6 = arith.mulf %2, %2 : vector<128x128xf32>
    %cst_6 = arith.constant dense<0.000000e+00> : vector<128xf32>
    %7 = vector.multi_reduction <add>, %6, %cst_6 [0] : vector<128x128xf32> to vector<128xf32>
    %8 = vector.shape_cast %7 : vector<128xf32> to vector<1x128xf32>
    %9 = vector.shape_cast %5 : vector<1x128xf32> to vector<1x1x128xf32>
    %10 = vector.shape_cast %9 : vector<1x1x128xf32> to vector<1x1x128xf32>
    %11 = vector.broadcast %10 : vector<1x1x128xf32> to vector<1x8x128xf32>
    %c0_7 = arith.constant 0 : index
    %c0_8 = arith.constant 0 : index
    %c0_9 = arith.constant 0 : index
    %12 = vector.load %arg4[%c0_7, %c0_8, %c0_9] : memref<1x8x128xf32, #tpu.memory_space<vmem>>, vector<1x8x128xf32>
    tpu.vector_store %arg4[%c0_7, %c0_8, %c0_9], %11 {strides = array<i32>} : memref<1x8x128xf32, #tpu.memory_space<vmem>>, vector<1x8x128xf32>,
    %13 = vector.shape_cast %8 : vector<1x128xf32> to vector<1x1x128xf32>
    %14 = vector.shape_cast %13 : vector<1x1x128xf32> to vector<1x1x128xf32>
    %15 = vector.broadcast %14 : vector<1x1x128xf32> to vector<1x8x128xf32>
    %c0_10 = arith.constant 0 : index
    %c0_11 = arith.constant 0 : index
    %c0_12 = arith.constant 0 : index
    %16 = vector.load %arg5[%c0_10, %c0_11, %c0_12] : memref<1x8x128xf32, #tpu.memory_space<vmem>>, vector<1x8x128xf32>
    tpu.vector_store %arg5[%c0_10, %c0_11, %c0_12], %15 {strides = array<i32>} : memref<1x8x128xf32, #tpu.memory_space<vmem>>, vector<1x8x128xf32>,
    return
  }
  func.func @transform_0(%arg0: i32) -> (i32, i32) {
    %c0_i32 = arith.constant 0 : i32
    %c0_i32_0 = arith.constant 0 : i32
    return %arg0, %c0_i32 : i32, i32
  }
  func.func @transform_1(%arg0: i32) -> (i32, i32) {
    %c0_i32 = arith.constant 0 : i32
    %c0_i32_0 = arith.constant 0 : i32
    %c0_i32_1 = arith.constant 0 : i32
    return %c0_i32, %c0_i32_0 : i32, i32
  }
  func.func @transform_2(%arg0: i32) -> (i32, i32) {
    %c0_i32 = arith.constant 0 : i32
    %c0_i32_0 = arith.constant 0 : i32
    return %arg0, %c0_i32 : i32, i32
  }
  func.func @transform_3(%arg0: i32) -> (i32, i32, i32) {
    %c0_i32 = arith.constant 0 : i32
    %c0_i32_0 = arith.constant 0 : i32
    %c0_i32_1 = arith.constant 0 : i32
    return %arg0, %c0_i32, %c0_i32_0 : i32, i32, i32
  }
  func.func @transform_4(%arg0: i32) -> (i32, i32, i32) {
    %c0_i32 = arith.constant 0 : i32
    %c0_i32_0 = arith.constant 0 : i32
    %c0_i32_1 = arith.constant 0 : i32
    return %arg0, %c0_i32, %c0_i32_0 : i32, i32, i32
  }
}

module attributes {stable_mosaic.version = 11 : i64} {
  func.func @bn_relu_kernel(%arg0: i32, %arg1: memref<128x128xf32, #tpu.memory_space<vmem>>, %arg2: memref<1x128xf32, #tpu.memory_space<vmem>>, %arg3: memref<1x128xf32, #tpu.memory_space<vmem>>, %arg4: memref<128x128xbf16, #tpu.memory_space<vmem>>) attributes {dimension_semantics = [#tpu.dimension_semantics<parallel>], iteration_bounds = array<i64: 1>, scalar_prefetch = 0 : i64, scratch_operands = 0 : i64, tpu.core_type = #tpu.core_type<tc>, window_params = [{transform_indices = @transform_0, window_bounds = array<i64: 128, 128>}, {pipeline_mode = #tpu.pipeline_mode<synchronous>, transform_indices = @transform_1, window_bounds = array<i64: 1, 128>}, {pipeline_mode = #tpu.pipeline_mode<synchronous>, transform_indices = @transform_2, window_bounds = array<i64: 1, 128>}, {transform_indices = @transform_3, window_bounds = array<i64: 128, 128>}]} {
    %c0 = arith.constant 0 : index
    %c0_0 = arith.constant 0 : index
    %0 = vector.load %arg1[%c0, %c0_0] : memref<128x128xf32, #tpu.memory_space<vmem>>, vector<128x128xf32>
    %c0_1 = arith.constant 0 : index
    %c0_2 = arith.constant 0 : index
    %1 = vector.load %arg2[%c0_1, %c0_2] : memref<1x128xf32, #tpu.memory_space<vmem>>, vector<1x128xf32>
    %2 = vector.broadcast %1 : vector<1x128xf32> to vector<128x128xf32>
    %3 = arith.mulf %0, %2 : vector<128x128xf32>
    %c0_3 = arith.constant 0 : index
    %c0_4 = arith.constant 0 : index
    %4 = vector.load %arg3[%c0_3, %c0_4] : memref<1x128xf32, #tpu.memory_space<vmem>>, vector<1x128xf32>
    %5 = vector.broadcast %4 : vector<1x128xf32> to vector<128x128xf32>
    %6 = arith.addf %3, %5 : vector<128x128xf32>
    %cst = arith.constant 0.000000e+00 : f32
    %7 = vector.broadcast %cst : f32 to vector<128x128xf32>
    %8 = arith.maximumf %6, %7 : vector<128x128xf32>
    %9 = arith.truncf %8 : vector<128x128xf32> to vector<128x128xbf16>
    %c0_5 = arith.constant 0 : index
    %c0_6 = arith.constant 0 : index
    %10 = vector.load %arg4[%c0_5, %c0_6] : memref<128x128xbf16, #tpu.memory_space<vmem>>, vector<128x128xbf16>
    tpu.vector_store %arg4[%c0_5, %c0_6], %9 {strides = array<i32>} : memref<128x128xbf16, #tpu.memory_space<vmem>>, vector<128x128xbf16>,
    return
  }
  func.func @transform_0(%arg0: i32) -> (i32, i32) {
    %c0_i32 = arith.constant 0 : i32
    %c0_i32_0 = arith.constant 0 : i32
    return %arg0, %c0_i32 : i32, i32
  }
  func.func @transform_1(%arg0: i32) -> (i32, i32) {
    %c0_i32 = arith.constant 0 : i32
    %c0_i32_0 = arith.constant 0 : i32
    %c0_i32_1 = arith.constant 0 : i32
    return %c0_i32, %c0_i32_0 : i32, i32
  }
  func.func @transform_2(%arg0: i32) -> (i32, i32) {
    %c0_i32 = arith.constant 0 : i32
    %c0_i32_0 = arith.constant 0 : i32
    %c0_i32_1 = arith.constant 0 : i32
    return %c0_i32, %c0_i32_0 : i32, i32
  }
  func.func @transform_3(%arg0: i32) -> (i32, i32) {
    %c0_i32 = arith.constant 0 : i32
    %c0_i32_0 = arith.constant 0 : i32
    return %arg0, %c0_i32 : i32, i32
  }
}

module attributes {stable_mosaic.version = 11 : i64} {
  func.func @bn_relu_kernel(%arg0: i32, %arg1: memref<128x128xf32, #tpu.memory_space<vmem>>, %arg2: memref<1x128xf32, #tpu.memory_space<vmem>>, %arg3: memref<1x128xf32, #tpu.memory_space<vmem>>, %arg4: memref<128x128xf32, #tpu.memory_space<vmem>>) attributes {dimension_semantics = [#tpu.dimension_semantics<parallel>], iteration_bounds = array<i64: 1>, scalar_prefetch = 0 : i64, scratch_operands = 0 : i64, tpu.core_type = #tpu.core_type<tc>, window_params = [{transform_indices = @transform_0, window_bounds = array<i64: 128, 128>}, {pipeline_mode = #tpu.pipeline_mode<synchronous>, transform_indices = @transform_1, window_bounds = array<i64: 1, 128>}, {pipeline_mode = #tpu.pipeline_mode<synchronous>, transform_indices = @transform_2, window_bounds = array<i64: 1, 128>}, {transform_indices = @transform_3, window_bounds = array<i64: 128, 128>}]} {
    %c0 = arith.constant 0 : index
    %c0_0 = arith.constant 0 : index
    %0 = vector.load %arg1[%c0, %c0_0] : memref<128x128xf32, #tpu.memory_space<vmem>>, vector<128x128xf32>
    %c0_1 = arith.constant 0 : index
    %c0_2 = arith.constant 0 : index
    %1 = vector.load %arg2[%c0_1, %c0_2] : memref<1x128xf32, #tpu.memory_space<vmem>>, vector<1x128xf32>
    %2 = vector.broadcast %1 : vector<1x128xf32> to vector<128x128xf32>
    %3 = arith.mulf %0, %2 : vector<128x128xf32>
    %c0_3 = arith.constant 0 : index
    %c0_4 = arith.constant 0 : index
    %4 = vector.load %arg3[%c0_3, %c0_4] : memref<1x128xf32, #tpu.memory_space<vmem>>, vector<1x128xf32>
    %5 = vector.broadcast %4 : vector<1x128xf32> to vector<128x128xf32>
    %6 = arith.addf %3, %5 : vector<128x128xf32>
    %cst = arith.constant 0.000000e+00 : f32
    %7 = vector.broadcast %cst : f32 to vector<128x128xf32>
    %8 = arith.maximumf %6, %7 : vector<128x128xf32>
    %c0_5 = arith.constant 0 : index
    %c0_6 = arith.constant 0 : index
    %9 = vector.load %arg4[%c0_5, %c0_6] : memref<128x128xf32, #tpu.memory_space<vmem>>, vector<128x128xf32>
    tpu.vector_store %arg4[%c0_5, %c0_6], %8 {strides = array<i32>} : memref<128x128xf32, #tpu.memory_space<vmem>>, vector<128x128xf32>,
    return
  }
  func.func @transform_0(%arg0: i32) -> (i32, i32) {
    %c0_i32 = arith.constant 0 : i32
    %c0_i32_0 = arith.constant 0 : i32
    return %arg0, %c0_i32 : i32, i32
  }
  func.func @transform_1(%arg0: i32) -> (i32, i32) {
    %c0_i32 = arith.constant 0 : i32
    %c0_i32_0 = arith.constant 0 : i32
    %c0_i32_1 = arith.constant 0 : i32
    return %c0_i32, %c0_i32_0 : i32, i32
  }
  func.func @transform_2(%arg0: i32) -> (i32, i32) {
    %c0_i32 = arith.constant 0 : i32
    %c0_i32_0 = arith.constant 0 : i32
    %c0_i32_1 = arith.constant 0 : i32
    return %c0_i32, %c0_i32_0 : i32, i32
  }
  func.func @transform_3(%arg0: i32) -> (i32, i32) {
    %c0_i32 = arith.constant 0 : i32
    %c0_i32_0 = arith.constant 0 : i32
    return %arg0, %c0_i32 : i32, i32
  }
}

</mosaic_0001>

<bundles_post_ra>
// kernel: _lambda_.5
= control target key start
LH: loop header
LB: loop body
LE: loop exit
PB: predicated region body
PF: predicated region fallthrough
CT: control target
= control target key end

     0   :  { %8 = vsyncpa [#allocation3], 0  ;;  %s530_s0 = inlined_call_operand.hbm [shape: f32[128,128], index: 0, kind: input, shape index: {}]   ;;  %s531_s1 = inlined_call_operand.hbm [shape: f32[1,128], index: 1, kind: input, shape index: {}]   ;;  %s532_s2 = inlined_call_operand.hbm [shape: f32[1,128], index: 2, kind: input, shape index: {}]   ;;  %s533_s3 = inlined_call_operand.hbm [shape: bf16[128,128], index: 3, kind: output, shape index: {}]  }
   0x1   :  { %9 = vsyncpa [#allocation6], 0 }
   0x2   :  { %10 = vsyncpa [#allocation4], 0  ;;  %s411_s12 = smov [#allocation5]   ;;  %s412_s14 = smov [#allocation2]  }
   0x3   :  { %s29_s13 = sshll.u32 %s411_s12, 4  ;;  %s16_s15 = sshll.u32 %s412_s14, 4  ;;  %s30_s13 = int_to_ptr.vmem [resolvable:$true] %s29_s13  ;;  %s439_s15 = int_to_ptr.vmem [resolvable:$true] %s16_s15 }
   0x4   :  { %s317_s18 = scalar_lea.hbm %s531_s1, 16 }
   0x5   :  { %p318_p0 = scmp.ne.s32.totalorder %s531_s1, %s317_s18  ;;  %p321_p1 = scmp.lt.u32.totalorder %s317_s18, %s531_s1 }
   0x7   :  { %p323_p2 = pnand %p321_p1, %p318_p0 }
   0x9   :  { %326 = shalt.err (!%p323_p2)
}
   0xa   :  { %s327_s23 = scalar_lea.vmem %s30_s13, 16  ;;  %s331_s24 = scalar_lea.vmem %s30_s13, 32 }
   0xb   :  { %p328_p3 = scmp.ne.s32.totalorder %s30_s13, %s327_s23  ;;  %p332_p4 = scmp.lt.s32.totalorder %s30_s13, %s30_s13 }
   0xc   :  { %p333_p5 = scmp.lt.s32.totalorder %s331_s24, %s327_s23 }
   0xe   :  { %p334_p6 = por %p333_p5, %p332_p4 }
  0x10   :  { %p335_p7 = pnand %p334_p6, %p328_p3 }
  0x12   :  { %338 = shalt.err (!%p335_p7)
}
  0x13   :  { %32 = dma.hbm_to_vmem [thread:$0]  %s531_s1, 16, %s30_s13, [#allocation6]  }
  0x14   :  { %s339_s29 = scalar_lea.hbm %s530_s0, 2048 }
  0x15   :  { %p340_p8 = scmp.ne.s32.totalorder %s530_s0, %s339_s29  ;;  %p343_p9 = scmp.lt.u32.totalorder %s339_s29, %s530_s0 }
  0x17   :  { %p345_p10 = pnand %p343_p9, %p340_p8 }
  0x19   :  { %348 = shalt.err (!%p345_p10)
}
  0x1a   :  { %s349_s7 = scalar_lea.vmem %s439_s15, 2048  ;;  %p354_p12 = scmp.lt.s32.totalorder %s439_s15, %s439_s15 }
  0x1b   :  { %p350_p11 = scmp.ne.s32.totalorder %s439_s15, %s349_s7  ;;  %p355_p13 = scmp.lt.s32.totalorder %s349_s7, %s349_s7 }
  0x1d   :  { %p356_p0 = por %p355_p13, %p354_p12 }
  0x1f   :  { %p357_p1 = pnand %p356_p0, %p350_p11 }
  0x21   :  { %360 = shalt.err (!%p357_p1)
}
  0x22   :  { %s413_s1 = smov 128   ;;  %s414_s8 = smov 8  }
  0x23   :  { %22 = dma.hbm_to_vmem [thread:$0]  %s530_s0, 2048, %s439_s15, [#allocation3], %s413_s1, %s413_s1, %s414_s8  }
  0x24   :  { %s415_s11 = smov [#allocation7]   ;;  %s361_s16 = scalar_lea.hbm %s532_s2, 16 }
  0x25   :  { %s39_s12 = sshll.u32 %s415_s11, 4  ;;  %p362_p2 = scmp.ne.s32.totalorder %s532_s2, %s361_s16  ;;  %s40_s12 = int_to_ptr.vmem [resolvable:$true] %s39_s12 }
  0x26   :  { %p365_p3 = scmp.lt.u32.totalorder %s361_s16, %s532_s2 }
  0x28   :  { %p367_p4 = pnand %p365_p3, %p362_p2 }
  0x2a   :  { %370 = shalt.err (!%p367_p4)
}
  0x2b   :  { %s371_s21 = scalar_lea.vmem %s40_s12, 16  ;;  %s375_s0 = scalar_lea.vmem %s40_s12, 32 }
  0x2c   :  { %p372_p5 = scmp.ne.s32.totalorder %s40_s12, %s371_s21  ;;  %p376_p6 = scmp.lt.s32.totalorder %s40_s12, %s40_s12 }
  0x2d   :  { %p377_p7 = scmp.lt.s32.totalorder %s375_s0, %s371_s21 }
  0x2f   :  { %p378_p8 = por %p377_p7, %p376_p6 }
  0x31   :  { %p379_p9 = pnand %p378_p8, %p372_p5 }
  0x33   :  { %382 = shalt.err (!%p379_p9)
}
  0x34   :  { %42 = dma.hbm_to_vmem [thread:$0]  %s532_s2, 16, %s40_s12, [#allocation6]  }
  0x35   :  { %405 = dma.done.wait [#allocation3], 2048  }
  0x36   :  { %406 = vsyncadd [#allocation3], 4294965248 }
  0x37   :  { %407 = dma.done.wait [#allocation6], 32  }
  0x38   :  { %408 = vsyncadd [#allocation6], 4294967264  ;;  %v52_v0 = vld [vmem:[#allocation2] sm:$0xff]  ;;  %v53_v1 = vld [vmem:[#allocation2 + $0x8] sm:$0xff]  ;;  %s416_s2 = smov [#allocation8]  }
  0x39   :  { %v482_v2 = vld [vmem:[#allocation5] ss:$0 sm:$0xff]  ;;  %v486_v5 = vld [vmem:[#allocation7] ss:$0 sm:$0xff]  ;;  %v54_v6 = vld [vmem:[#allocation2 + $0x10] sm:$0xff]  ;;  %s215_s23 = sshll.u32 %s416_s2, 4  ;;  %s216_s23 = int_to_ptr.vmem [resolvable:$true] %s215_s23 }
  0x3a   :  { %v75_v3 = vmul.f32 %v482_v2, %v52_v0  ;;  %v76_v4 = vmul.f32 %v482_v2, %v53_v1  ;;  %v55_v7 = vld [vmem:[#allocation2 + $0x18] sm:$0xff]  ;;  %v77_v8 = vmul.f32 %v482_v2, %v54_v6  ;;  %v56_v10 = vld [vmem:[#allocation2 + $0x20] sm:$0xff]  ;;  %v57_v11 = vld [vmem:[#allocation2 + $0x28] sm:$0xff]  ;;  %s383_s24 = scalar_lea.vmem %s216_s23, 1024  ;;  %p388_p11 = scmp.lt.s32.totalorder %s216_s23, %s216_s23 }
  0x3b   :  { %v78_v9 = vmul.f32 %v482_v2, %v55_v7  ;;  %v58_v12 = vld [vmem:[#allocation2 + $0x30] sm:$0xff]  ;;  %v79_v15 = vmul.f32 %v482_v2, %v56_v10  ;;  %v80_v16 = vmul.f32 %v482_v2, %v57_v11  ;;  %v59_v17 = vld [vmem:[#allocation2 + $0x38] sm:$0xff]  ;;  %v60_v22 = vld [vmem:[#allocation2 + $0x40] sm:$0xff]  ;;  %p384_p10 = scmp.ne.s32.totalorder %s216_s23, %s383_s24  ;;  %p389_p12 = scmp.lt.s32.totalorder %s383_s24, %s383_s24 }
  0x3c   :  { %v98_v13 = vadd.f32 %v486_v5, %v75_v3  ;;  %v99_v14 = vadd.f32 %v486_v5, %v76_v4  ;;  %v100_v18 = vadd.f32 %v486_v5, %v77_v8  ;;  %v81_v20 = vmul.f32 %v482_v2, %v58_v12  ;;  %v61_v27 = vld [vmem:[#allocation2 + $0x48] sm:$0xff]  ;;  %v62_v32 = vld [vmem:[#allocation2 + $0x50] sm:$0xff]  ;;  %v63_v33 = vld [vmem:[#allocation2 + $0x58] sm:$0xff] }
  0x3d   :  { %v101_v19 = vadd.f32 %v486_v5, %v78_v9  ;;  %v82_v21 = vmul.f32 %v482_v2, %v59_v17  ;;  %v102_v25 = vadd.f32 %v486_v5, %v79_v15  ;;  %v103_v26 = vadd.f32 %v486_v5, %v80_v16  ;;  %v64_v38 = vld [vmem:[#allocation2 + $0x60] sm:$0xff]  ;;  %v65_v39 = vld [vmem:[#allocation2 + $0x68] sm:$0xff]  ;;  %v66_v44 = vld [vmem:[#allocation2 + $0x70] sm:$0xff]  ;;  %p390_p13 = por %p389_p12, %p388_p11 }
  0x3e   :  { %v114_v23 = vmax.f32 %v98_v13, 0.0  ;;  %v115_v24 = vmax.f32 %v99_v14, 0.0  ;;  %v116_v28 = vmax.f32 %v100_v18, 0.0  ;;  %v104_v30 = vadd.f32 %v486_v5, %v81_v20  ;;  %v67_v49 = vld [vmem:[#allocation2 + $0x78] sm:$0xff] }
  0x3f   :  { %v117_v29 = vmax.f32 %v101_v19, 0.0  ;;  %v105_v31 = vadd.f32 %v486_v5, %v82_v21  ;;  %v118_v35 = vmax.f32 %v102_v25, 0.0  ;;  %v119_v36 = vmax.f32 %v103_v26, 0.0  ;;  %p391_p0 = pnand %p390_p13, %p384_p10 }
  0x40   :  { %v265_v34 = vpack.c.bf16 %v115_v24, %v114_v23  ;;  %v83_v37 = vmul.f32 %v482_v2, %v60_v22  ;;  %v120_v41 = vmax.f32 %v104_v30, 0.0  ;;  %v84_v43 = vmul.f32 %v482_v2, %v61_v27 }
  0x41   :  { %v270_v40 = vpack.c.bf16 %v117_v29, %v116_v28  ;;  %v121_v42 = vmax.f32 %v105_v31, 0.0  ;;  %v275_v45 = vpack.c.bf16 %v119_v36, %v118_v35  ;;  %v85_v47 = vmul.f32 %v482_v2, %v62_v32 }
  0x42   :  { %266 = vst [vmem:[#allocation8] sm:$0xff] %v265_v34   ;;  %v106_v46 = vadd.f32 %v486_v5, %v83_v37  ;;  %v86_v48 = vmul.f32 %v482_v2, %v63_v33  ;;  %v107_v51 = vadd.f32 %v486_v5, %v84_v43  ;;  %v87_v52 = vmul.f32 %v482_v2, %v64_v38 }
  0x43   :  { %302 = vst [vmem:[#allocation8 + $0x8] sm:$0xff] %v270_v40   ;;  %v280_v50 = vpack.c.bf16 %v121_v42, %v120_v41  ;;  %v88_v53 = vmul.f32 %v482_v2, %v65_v39  ;;  %303 = vst [vmem:[#allocation8 + $0x10] sm:$0xff] %v275_v45   ;;  %v108_v55 = vadd.f32 %v486_v5, %v85_v47 }
  0x44   :  { %v122_v54 = vmax.f32 %v106_v46, 0.0  ;;  %v109_v56 = vadd.f32 %v486_v5, %v86_v48  ;;  %v89_v57 = vmul.f32 %v482_v2, %v66_v44  ;;  %v123_v58 = vmax.f32 %v107_v51, 0.0 }
  0x45   :  { %304 = vst [vmem:[#allocation8 + $0x18] sm:$0xff] %v280_v50   ;;  %v110_v59 = vadd.f32 %v486_v5, %v87_v52  ;;  %v111_v60 = vadd.f32 %v486_v5, %v88_v53  ;;  %v90_v61 = vmul.f32 %v482_v2, %v67_v49  ;;  %v124_v62 = vmax.f32 %v108_v55, 0.0 }
  0x46   :  { %v125_v63 = vmax.f32 %v109_v56, 0.0  ;;  %v112_v0 = vadd.f32 %v486_v5, %v89_v57  ;;  %v285_v1 = vpack.c.bf16 %v123_v58, %v122_v54 }
  0x47   :  { %v126_v3 = vmax.f32 %v110_v59, 0.0  ;;  %v127_v4 = vmax.f32 %v111_v60, 0.0  ;;  %v113_v6 = vadd.f32 %v486_v5, %v90_v61 }
  0x48   :  { %v290_v7 = vpack.c.bf16 %v125_v63, %v124_v62  ;;  %v128_v8 = vmax.f32 %v112_v0, 0.0  ;;  %305 = vst [vmem:[#allocation8 + $0x20] sm:$0xff] %v285_v1  }
  0x49   :  { %v295_v9 = vpack.c.bf16 %v127_v4, %v126_v3  ;;  %v129_v10 = vmax.f32 %v113_v6, 0.0 }
  0x4a   :  { %306 = vst [vmem:[#allocation8 + $0x28] sm:$0xff] %v290_v7  }
  0x4b   :  { %307 = vst [vmem:[#allocation8 + $0x30] sm:$0xff] %v295_v9   ;;  %v300_v11 = vpack.c.bf16 %v129_v10, %v128_v8 }
  0x4d   :  { %308 = vst [vmem:[#allocation8 + $0x38] sm:$0xff] %v300_v11  }
  0x4e   :  { %394 = shalt.err (!%p391_p0)
}
  0x4f   :  { %s395_s27 = scalar_lea.hbm %s533_s3, 1024 }
  0x50   :  { %p396_p1 = scmp.ne.s32.totalorder %s533_s3, %s395_s27  ;;  %p399_p2 = scmp.lt.u32.totalorder %s395_s27, %s533_s3 }
  0x52   :  { %p401_p3 = pnand %p399_p2, %p396_p1 }
  0x54   :  { %404 = shalt.err (!%p401_p3)
}
  0x55   :  { %s417_s5 = smov 64   ;;  %s418_s6 = smov 4  }
  0x56   :  { %221 = dma.vmem_to_hbm [thread:$0]  %s216_s23, 1024, %s533_s3, [#allocation4], %s417_s5, %s417_s5, %s418_s6  }
  0x57   :  { %409 = dma.done.wait [#allocation4], 1024  }
  0x58   :  { %410 = vsyncadd [#allocation4], 4294966272 }
  0x59   :  { %225 = vsyncpa [#allocation3], 1 }
  0x5a   :  { %226 = vsyncpa [#allocation6], 1 }
  0x5b   :  { %227 = vsyncpa [#allocation4], 1 }

// kernel: _lambda_.4
= control target key start
LH: loop header
LB: loop body
LE: loop exit
PB: predicated region body
PF: predicated region fallthrough
CT: control target
= control target key end

     0   :  { %10 = vsyncpa [#allocation3], 0  ;;  %s733_s0 = inlined_call_operand.hbm [shape: bf16[128,128], index: 0, kind: input, shape index: {}]   ;;  %s734_s1 = inlined_call_operand.hbm [shape: bf16[128,128], index: 1, kind: input, shape index: {}]   ;;  %s735_s2 = inlined_call_operand.hbm [shape: f32[128,128], index: 2, kind: output, shape index: {0}]   ;;  %s736_s3 = inlined_call_operand.hbm [shape: f32[1,8,128], index: 3, kind: output, shape index: {1}]   ;;  %s737_s4 = inlined_call_operand.hbm [shape: f32[1,8,128], index: 4, kind: output, shape index: {2}]  }
   0x1   :  { %11 = vsyncpa [#allocation6], 0 }
   0x2   :  { %12 = vsyncpa [#allocation4], 0 }
   0x3   :  { %13 = vsyncpa [#allocation9], 0  ;;  %s614_s15 = smov [#allocation2]   ;;  %s496_s19 = scalar_lea.hbm %s733_s0, 1024 }
   0x4   :  { %s19_s16 = sshll.u32 %s614_s15, 4  ;;  %p497_p0 = scmp.ne.s32.totalorder %s733_s0, %s496_s19  ;;  %s20_s16 = int_to_ptr.vmem [resolvable:$true] %s19_s16 }
   0x5   :  { %p500_p1 = scmp.lt.u32.totalorder %s496_s19, %s733_s0 }
   0x7   :  { %p502_p2 = pnand %p500_p1, %p497_p0 }
   0x9   :  { %505 = shalt.err (!%p502_p2)
}
   0xa   :  { %s506_s24 = scalar_lea.vmem %s20_s16, 1024  ;;  %p511_p4 = scmp.lt.s32.totalorder %s20_s16, %s20_s16 }
   0xb   :  { %p507_p3 = scmp.ne.s32.totalorder %s20_s16, %s506_s24  ;;  %p512_p5 = scmp.lt.s32.totalorder %s506_s24, %s506_s24 }
   0xd   :  { %p513_p6 = por %p512_p5, %p511_p4 }
   0xf   :  { %p514_p7 = pnand %p513_p6, %p507_p3 }
  0x11   :  { %517 = shalt.err (!%p514_p7)
}
  0x12   :  { %s615_s25 = smov 64   ;;  %s616_s26 = smov 4  }
  0x13   :  { %25 = dma.hbm_to_vmem [thread:$0]  %s733_s0, 1024, %s20_s16, [#allocation3], %s615_s25, %s615_s25, %s616_s26  }
  0x14   :  { %s617_s29 = smov [#allocation5]   ;;  %s518_s7 = scalar_lea.hbm %s734_s1, 1024 }
  0x15   :  { %s31_s30 = sshll.u32 %s617_s29, 4  ;;  %p519_p8 = scmp.ne.s32.totalorder %s734_s1, %s518_s7  ;;  %s32_s30 = int_to_ptr.vmem [resolvable:$true] %s31_s30 }
  0x16   :  { %p522_p9 = scmp.lt.u32.totalorder %s518_s7, %s734_s1 }
  0x18   :  { %p524_p10 = pnand %p522_p9, %p519_p8 }
  0x1a   :  { %527 = shalt.err (!%p524_p10)
}
  0x1b   :  { %s528_s12 = scalar_lea.vmem %s32_s30, 1024  ;;  %p533_p12 = scmp.lt.s32.totalorder %s32_s30, %s32_s30 }
  0x1c   :  { %p529_p11 = scmp.ne.s32.totalorder %s32_s30, %s528_s12  ;;  %p534_p13 = scmp.lt.s32.totalorder %s528_s12, %s528_s12 }
  0x1e   :  { %p535_p0 = por %p534_p13, %p533_p12 }
  0x20   :  { %p536_p1 = pnand %p535_p0, %p529_p11 }
  0x22   :  { %539 = shalt.err (!%p536_p1)
}
  0x23   :  { %37 = dma.hbm_to_vmem [thread:$0]  %s734_s1, 1024, %s32_s30, [#allocation6], %s615_s25, %s615_s25, %s616_s26  }
  0x24   :  { %606 = dma.done.wait [#allocation3], 1024  }
  0x25   :  { %607 = vsyncadd [#allocation3], 4294966272 }
  0x26   :  { %608 = dma.done.wait [#allocation6], 1024  }
  0x27   :  { %609 = vsyncadd [#allocation6], 4294966272  ;;  %v480_v0 = vld [vmem:[#allocation5] sm:$0xff]   ;;  %v481_v1 = vld [vmem:[#allocation5 + $0x8] sm:$0xff]   ;;  %s618_s1 = smov [#allocation7]  }
  0x28   :  { %423 = vmatprep.subr.bf16.mxu0 %v480_v0  ;;  %455 = vmatprep.subr.bf16.mxu1 %v480_v0  ;;  %v482_v2 = vld [vmem:[#allocation5 + $0x10] sm:$0xff]   ;;  %v483_v3 = vld [vmem:[#allocation5 + $0x18] sm:$0xff]   ;;  %v488_v4 = vld [vmem:[#allocation2] sm:$0xff]   ;;  %s351_s14 = sshll.u32 %s618_s1, 4  ;;  %s681_s14 = int_to_ptr.vmem [resolvable:$true] %s351_s14 }
  0x29   :  { %424 = vmatpush3.bf16.msra.mxu0 %v480_v0  ;;  %463 = vmatpush3.bf16.msra.mxu1 %v480_v0  ;;  %v484_v5 = vld [vmem:[#allocation5 + $0x20] sm:$0xff]   ;;  %v485_v7 = vld [vmem:[#allocation5 + $0x28] sm:$0xff]   ;;  %v486_v8 = vld [vmem:[#allocation5 + $0x30] sm:$0xff]   ;;  %s540_s15 = scalar_lea.vmem %s681_s14, 2048  ;;  %p545_p3 = scmp.lt.s32.totalorder %s681_s14, %s681_s14 }
  0x2a   :  { %425 = vmatprep.subr.bf16.mxu0 %v481_v1  ;;  %456 = vmatprep.subr.bf16.mxu1 %v481_v1  ;;  %v492_v6 = vld [vmem:[#allocation2 + $0x20] sm:$0xff]   ;;  %v487_v9 = vld [vmem:[#allocation5 + $0x38] sm:$0xff]   ;;  %v489_v10 = vld [vmem:[#allocation2 + $0x8] sm:$0xff]   ;;  %p541_p2 = scmp.ne.s32.totalorder %s681_s14, %s540_s15  ;;  %p546_p4 = scmp.lt.s32.totalorder %s540_s15, %s540_s15 }
  0x2b   :  { %439 = vmatprep.mubr.bf16.mxu0 %v488_v4  ;;  %447 = vmatprep.mubr.bf16.mxu1 %v492_v6  ;;  %v493_v11 = vld [vmem:[#allocation2 + $0x28] sm:$0xff]   ;;  %v490_v12 = vld [vmem:[#allocation2 + $0x10] sm:$0xff]   ;;  %v491_v14 = vld [vmem:[#allocation2 + $0x18] sm:$0xff]  }
  0x2c   :  { %v494_v13 = vld [vmem:[#allocation2 + $0x30] sm:$0xff]   ;;  %v495_v15 = vld [vmem:[#allocation2 + $0x38] sm:$0xff]   ;;  %p547_p5 = por %p546_p4, %p545_p3 }
  0x2d   :  { %426 = vmatpush3.bf16.msra.mxu0 %v481_v1  ;;  %464 = vmatpush3.bf16.msra.mxu1 %v481_v1 }
  0x2e   :  { %427 = vmatprep.subr.bf16.mxu0 %v482_v2  ;;  %457 = vmatprep.subr.bf16.mxu1 %v482_v2  ;;  %p548_p6 = pnand %p547_p5, %p541_p2 }
  0x31   :  { %428 = vmatpush3.bf16.msra.mxu0 %v482_v2  ;;  %465 = vmatpush3.bf16.msra.mxu1 %v482_v2 }
  0x32   :  { %429 = vmatprep.subr.bf16.mxu0 %v483_v3  ;;  %458 = vmatprep.subr.bf16.mxu1 %v483_v3 }
  0x35   :  { %430 = vmatpush3.bf16.msra.mxu0 %v483_v3  ;;  %466 = vmatpush3.bf16.msra.mxu1 %v483_v3 }
  0x36   :  { %431 = vmatprep.subr.bf16.mxu0 %v484_v5  ;;  %459 = vmatprep.subr.bf16.mxu1 %v484_v5 }
  0x39   :  { %432 = vmatpush3.bf16.msra.mxu0 %v484_v5  ;;  %467 = vmatpush3.bf16.msra.mxu1 %v484_v5 }
  0x3a   :  { %433 = vmatprep.subr.bf16.mxu0 %v485_v7  ;;  %460 = vmatprep.subr.bf16.mxu1 %v485_v7 }
  0x3d   :  { %434 = vmatpush3.bf16.msra.mxu0 %v485_v7  ;;  %468 = vmatpush3.bf16.msra.mxu1 %v485_v7 }
  0x3e   :  { %435 = vmatprep.subr.bf16.mxu0 %v486_v8  ;;  %461 = vmatprep.subr.bf16.mxu1 %v486_v8 }
  0x41   :  { %436 = vmatpush3.bf16.msra.mxu0 %v486_v8  ;;  %469 = vmatpush3.bf16.msra.mxu1 %v486_v8 }
  0x42   :  { %437 = vmatprep.subr.bf16.mxu0 %v487_v9  ;;  %462 = vmatprep.subr.bf16.mxu1 %v487_v9 }
  0x45   :  { %438 = vmatpush3.bf16.msra.mxu0 %v487_v9  ;;  %470 = vmatpush3.bf16.msra.mxu1 %v487_v9 }
  0x48   :  { %440 = vmatmul.mubr.bf16.vlgmr.msra.gmra.mrb[0].mxu0 %v489_v10  ;;  %448 = vmatmul.mubr.bf16.vlgmr.msra.gmra.mrb[0].mxu1 %v493_v11 }
  0x49   :  { %443 = vmatprep.mubr.bf16.mxu0 %v490_v12  ;;  %451 = vmatprep.mubr.bf16.mxu1 %v494_v13 }
  0x50   :  { %444 = vmatmul.mubr.bf16.gmra.mrb[4].mxu0 %v491_v14  ;;  %452 = vmatmul.mubr.bf16.gmra.mrb[4].mxu1 %v495_v15 }
 0x11b   :  { %v441_v16 = vpop.f32.mrb[0].mxu0  ;;  %v672_v17 = vpop.f32.mrb[0].mxu1 }
 0x11c   :  { %272 = vst [vmem:[#allocation7 + $0x10] sm:$0xff] %v441_v16  ;;  %v207_v18 = vpop.f32.mrb[1].mxu0  ;;  %280 = vst [vmem:[#allocation7 + $0x50] sm:$0xff] %v672_v17  ;;  %v675_v19 = vpop.f32.mrb[1].mxu1  ;;  %v309_v27 = vmul.f32 %v441_v16, %v441_v16 }
 0x11d   :  { %270 = vst [vmem:[#allocation7] sm:$0xff] %v207_v18  ;;  %v442_v20 = vpop.f32.mrb[2].mxu0  ;;  %278 = vst [vmem:[#allocation7 + $0x40] sm:$0xff] %v675_v19  ;;  %v678_v21 = vpop.f32.mrb[2].mxu1  ;;  %v307_v24 = vmul.f32 %v207_v18, %v207_v18 }
 0x11e   :  { %273 = vst [vmem:[#allocation7 + $0x18] sm:$0xff] %v442_v20  ;;  %v210_v22 = vpop.f32.mrb[3].mxu0  ;;  %281 = vst [vmem:[#allocation7 + $0x58] sm:$0xff] %v678_v21  ;;  %v242_v23 = vpop.f32.mrb[3].mxu1  ;;  %v310_v30 = vmul.f32 %v442_v20, %v442_v20 }
 0x11f   :  { %271 = vst [vmem:[#allocation7 + $0x8] sm:$0xff] %v210_v22  ;;  %v286_v25 = vadd.f32 %v210_v22, %v207_v18  ;;  %v308_v26 = vmul.f32 %v210_v22, %v210_v22  ;;  %279 = vst [vmem:[#allocation7 + $0x48] sm:$0xff] %v242_v23 }
 0x121   :  { %v287_v28 = vadd.f32 %v441_v16, %v286_v25  ;;  %v323_v29 = vadd.f32 %v308_v26, %v307_v24 }
 0x123   :  { %v324_v31 = vadd.f32 %v323_v29, %v309_v27  ;;  %v445_v32 = vpop.f32.mrb[4].mxu0  ;;  %v288_v33 = vadd.f32 %v442_v20, %v287_v28  ;;  %v453_v34 = vpop.f32.mrb[4].mxu1 }
 0x124   :  { %276 = vst [vmem:[#allocation7 + $0x30] sm:$0xff] %v445_v32  ;;  %v223_v35 = vpop.f32.mrb[5].mxu0  ;;  %284 = vst [vmem:[#allocation7 + $0x70] sm:$0xff] %v453_v34  ;;  %v255_v36 = vpop.f32.mrb[5].mxu1 }
 0x125   :  { %274 = vst [vmem:[#allocation7 + $0x20] sm:$0xff] %v223_v35  ;;  %v289_v37 = vadd.f32 %v288_v33, %v223_v35  ;;  %v311_v38 = vmul.f32 %v223_v35, %v223_v35  ;;  %v325_v39 = vadd.f32 %v324_v31, %v310_v30  ;;  %v446_v40 = vpop.f32.mrb[6].mxu0  ;;  %282 = vst [vmem:[#allocation7 + $0x60] sm:$0xff] %v255_v36  ;;  %v454_v41 = vpop.f32.mrb[6].mxu1 }
 0x126   :  { %277 = vst [vmem:[#allocation7 + $0x38] sm:$0xff] %v446_v40  ;;  %v226_v42 = vpop.f32.mrb[7].mxu0  ;;  %285 = vst [vmem:[#allocation7 + $0x78] sm:$0xff] %v454_v41  ;;  %v258_v43 = vpop.f32.mrb[7].mxu1 }
 0x127   :  { %v326_v44 = vadd.f32 %v325_v39, %v311_v38  ;;  %275 = vst [vmem:[#allocation7 + $0x28] sm:$0xff] %v226_v42  ;;  %v290_v45 = vadd.f32 %v289_v37, %v226_v42  ;;  %v312_v46 = vmul.f32 %v226_v42, %v226_v42  ;;  %283 = vst [vmem:[#allocation7 + $0x68] sm:$0xff] %v258_v43 }
 0x128   :  { %551 = shalt.err (!%p548_p6)
}
 0x129   :  { %s552_s18 = scalar_lea.hbm %s735_s2, 2048 }
 0x12a   :  { %p553_p7 = scmp.ne.s32.totalorder %s735_s2, %s552_s18  ;;  %p556_p8 = scmp.lt.u32.totalorder %s552_s18, %s735_s2 }
 0x12c   :  { %p558_p9 = pnand %p556_p8, %p553_p7 }
 0x12e   :  { %561 = shalt.err (!%p558_p9)
}
 0x12f   :  { %s619_s23 = smov 128   ;;  %s620_s24 = smov 8   ;;  %v313_v47 = vmul.f32 %v445_v32, %v445_v32  ;;  %v291_v48 = vadd.f32 %v445_v32, %v290_v45  ;;  %v327_v49 = vadd.f32 %v326_v44, %v312_v46  ;;  %v314_v50 = vmul.f32 %v446_v40, %v446_v40 }
 0x130   :  { %357 = dma.vmem_to_hbm [thread:$0]  %s681_s14, 2048, %s735_s2, [#allocation4], %s619_s23, %s619_s23, %s620_s24   ;;  %v315_v53 = vmul.f32 %v675_v19, %v675_v19  ;;  %v316_v58 = vmul.f32 %v242_v23, %v242_v23  ;;  %v317_v59 = vmul.f32 %v672_v17, %v672_v17  ;;  %v318_v62 = vmul.f32 %v678_v21, %v678_v21 }
 0x131   :  { %v328_v51 = vadd.f32 %v327_v49, %v313_v47  ;;  %v292_v52 = vadd.f32 %v446_v40, %v291_v48  ;;  %v319_v1 = vmul.f32 %v255_v36, %v255_v36  ;;  %v320_v6 = vmul.f32 %v258_v43, %v258_v43  ;;  %s621_s2 = smov [#allocation8]   ;;  %s622_s28 = smov [#allocation10]  }
 0x132   :  { %v321_v7 = vmul.f32 %v453_v34, %v453_v34  ;;  %v322_v10 = vmul.f32 %v454_v41, %v454_v41  ;;  %s364_s27 = sshll.u32 %s621_s2, 4  ;;  %s374_s29 = sshll.u32 %s622_s28, 4  ;;  %s365_s27 = int_to_ptr.vmem [resolvable:$true] %s364_s27  ;;  %s375_s29 = int_to_ptr.vmem [resolvable:$true] %s374_s29 }
 0x133   :  { %v293_v54 = vadd.f32 %v292_v52, %v675_v19  ;;  %v329_v55 = vadd.f32 %v328_v51, %v314_v50  ;;  %s562_s30 = scalar_lea.vmem %s365_s27, 128  ;;  %p567_p11 = scmp.lt.s32.totalorder %s365_s27, %s365_s27 }
 0x134   :  { %p563_p10 = scmp.ne.s32.totalorder %s365_s27, %s562_s30  ;;  %p568_p12 = scmp.lt.s32.totalorder %s562_s30, %s562_s30 }
 0x135   :  { %v330_v56 = vadd.f32 %v329_v55, %v315_v53  ;;  %v294_v57 = vadd.f32 %v293_v54, %v242_v23 }
 0x136   :  { %p569_p13 = por %p568_p12, %p567_p11 }
 0x137   :  { %v295_v60 = vadd.f32 %v672_v17, %v294_v57  ;;  %v331_v61 = vadd.f32 %v330_v56, %v316_v58 }
 0x138   :  { %p570_p0 = pnand %p569_p13, %p563_p10 }
 0x139   :  { %v332_v63 = vadd.f32 %v331_v61, %v317_v59  ;;  %v296_v0 = vadd.f32 %v678_v21, %v295_v60 }
 0x13b   :  { %v297_v2 = vadd.f32 %v296_v0, %v255_v36  ;;  %v333_v3 = vadd.f32 %v332_v63, %v318_v62 }
 0x13d   :  { %v334_v4 = vadd.f32 %v333_v3, %v319_v1  ;;  %v298_v5 = vadd.f32 %v297_v2, %v258_v43 }
 0x13f   :  { %v299_v8 = vadd.f32 %v453_v34, %v298_v5  ;;  %v335_v9 = vadd.f32 %v334_v4, %v320_v6 }
 0x141   :  { %v300_v11 = vadd.f32 %v454_v41, %v299_v8  ;;  %v336_v12 = vadd.f32 %v335_v9, %v321_v7 }
 0x143   :  { %v301_v13 = vrot.slane %v300_v11, 4  ;;  %v337_v14 = vadd.f32 %v336_v12, %v322_v10 }
 0x145   :  { %v338_v15 = vrot.slane %v337_v14, 4  ;;  %v302_v16 = vadd.f32 %v301_v13, %v300_v11 }
 0x147   :  { %v303_v17 = vrot.slane %v302_v16, 2  ;;  %v339_v18 = vadd.f32 %v338_v15, %v337_v14 }
 0x149   :  { %v304_v19 = vadd.f32 %v303_v17, %v302_v16  ;;  %v340_v20 = vrot.slane %v339_v18, 2 }
 0x14b   :  { %v305_v21 = vrot.slane %v304_v19, 1  ;;  %v341_v22 = vadd.f32 %v340_v20, %v339_v18 }
 0x14d   :  { %v306_v23 = vadd.f32 %v305_v21, %v304_v19  ;;  %v342_v24 = vrot.slane %v341_v22, 1 }
 0x14f   :  { %344 = vst [vmem:[#allocation8] sm:$0xff] %v306_v23  ;;  %v343_v25 = vadd.f32 %v342_v24, %v341_v22 }
 0x150   :  { %573 = shalt.err (!%p570_p0)
}
 0x151   :  { %s574_s7 = scalar_lea.hbm %s736_s3, 128 }
 0x152   :  { %p575_p1 = scmp.ne.s32.totalorder %s736_s3, %s574_s7  ;;  %p578_p2 = scmp.lt.u32.totalorder %s574_s7, %s736_s3 }
 0x154   :  { %p580_p3 = pnand %p578_p2, %p575_p1 }
 0x156   :  { %583 = shalt.err (!%p580_p3)
}
 0x157   :  { %367 = dma.vmem_to_hbm [thread:$0]  %s365_s27, 128, %s736_s3, [#allocation9]   ;;  %345 = vst [vmem:[#allocation10] sm:$0xff] %v343_v25 }
 0x158   :  { %s584_s13 = scalar_lea.vmem %s375_s29, 128  ;;  %p589_p5 = scmp.lt.s32.totalorder %s375_s29, %s375_s29 }
 0x159   :  { %p585_p4 = scmp.ne.s32.totalorder %s375_s29, %s584_s13  ;;  %p590_p6 = scmp.lt.s32.totalorder %s584_s13, %s584_s13 }
 0x15b   :  { %p591_p7 = por %p590_p6, %p589_p5 }
 0x15d   :  { %p592_p8 = pnand %p591_p7, %p585_p4 }
 0x15f   :  { %595 = shalt.err (!%p592_p8)
}
 0x160   :  { %s596_s15 = scalar_lea.hbm %s737_s4, 128 }
 0x161   :  { %p597_p9 = scmp.ne.s32.totalorder %s737_s4, %s596_s15  ;;  %p600_p10 = scmp.lt.u32.totalorder %s596_s15, %s737_s4 }
 0x163   :  { %p602_p11 = pnand %p600_p10, %p597_p9 }
 0x165   :  { %605 = shalt.err (!%p602_p11)
}
 0x166   :  { %377 = dma.vmem_to_hbm [thread:$0]  %s375_s29, 128, %s737_s4, [#allocation9]  }
 0x167   :  { %610 = dma.done.wait [#allocation4], 2048  }
 0x168   :  { %611 = vsyncadd [#allocation4], 4294965248 }
 0x169   :  { %612 = dma.done.wait [#allocation9], 256  }
 0x16a   :  { %613 = vsyncadd [#allocation9], 4294967040 }
 0x16b   :  { %387 = vsyncpa [#allocation3], 1 }
 0x16c   :  { %388 = vsyncpa [#allocation6], 1 }
 0x16d   :  { %389 = vsyncpa [#allocation4], 1 }
 0x16e   :  { %390 = vsyncpa [#allocation9], 1 }

// kernel: _lambda_.7
= control target key start
LH: loop header
LB: loop body
LE: loop exit
PB: predicated region body
PF: predicated region fallthrough
CT: control target
= control target key end

     0   :  { %8 = vsyncpa [#allocation3], 0  ;;  %s371_s0 = inlined_call_operand.hbm [shape: f32[128,128], index: 0, kind: input, shape index: {}]   ;;  %s372_s1 = inlined_call_operand.hbm [shape: f32[1,128], index: 1, kind: input, shape index: {}]   ;;  %s373_s2 = inlined_call_operand.hbm [shape: f32[1,128], index: 2, kind: input, shape index: {}]   ;;  %s374_s3 = inlined_call_operand.hbm [shape: f32[128,128], index: 3, kind: output, shape index: {}]  }
   0x1   :  { %9 = vsyncpa [#allocation6], 0 }
   0x2   :  { %10 = vsyncpa [#allocation4], 0  ;;  %s266_s12 = smov [#allocation5]   ;;  %s267_s14 = smov [#allocation2]  }
   0x3   :  { %s29_s13 = sshll.u32 %s266_s12, 4  ;;  %s16_s15 = sshll.u32 %s267_s14, 4  ;;  %s30_s13 = int_to_ptr.vmem [resolvable:$true] %s29_s13  ;;  %s292_s15 = int_to_ptr.vmem [resolvable:$true] %s16_s15 }
   0x4   :  { %s172_s18 = scalar_lea.hbm %s372_s1, 16 }
   0x5   :  { %p173_p0 = scmp.ne.s32.totalorder %s372_s1, %s172_s18  ;;  %p176_p1 = scmp.lt.u32.totalorder %s172_s18, %s372_s1 }
   0x7   :  { %p178_p2 = pnand %p176_p1, %p173_p0 }
   0x9   :  { %181 = shalt.err (!%p178_p2)
}
   0xa   :  { %s182_s23 = scalar_lea.vmem %s30_s13, 16  ;;  %s186_s24 = scalar_lea.vmem %s30_s13, 32 }
   0xb   :  { %p183_p3 = scmp.ne.s32.totalorder %s30_s13, %s182_s23  ;;  %p187_p4 = scmp.lt.s32.totalorder %s30_s13, %s30_s13 }
   0xc   :  { %p188_p5 = scmp.lt.s32.totalorder %s186_s24, %s182_s23 }
   0xe   :  { %p189_p6 = por %p188_p5, %p187_p4 }
  0x10   :  { %p190_p7 = pnand %p189_p6, %p183_p3 }
  0x12   :  { %193 = shalt.err (!%p190_p7)
}
  0x13   :  { %32 = dma.hbm_to_vmem [thread:$0]  %s372_s1, 16, %s30_s13, [#allocation6]  }
  0x14   :  { %s194_s29 = scalar_lea.hbm %s371_s0, 2048 }
  0x15   :  { %p195_p8 = scmp.ne.s32.totalorder %s371_s0, %s194_s29  ;;  %p198_p9 = scmp.lt.u32.totalorder %s194_s29, %s371_s0 }
  0x17   :  { %p200_p10 = pnand %p198_p9, %p195_p8 }
  0x19   :  { %203 = shalt.err (!%p200_p10)
}
  0x1a   :  { %s204_s7 = scalar_lea.vmem %s292_s15, 2048  ;;  %p209_p12 = scmp.lt.s32.totalorder %s292_s15, %s292_s15 }
  0x1b   :  { %p205_p11 = scmp.ne.s32.totalorder %s292_s15, %s204_s7  ;;  %p210_p13 = scmp.lt.s32.totalorder %s204_s7, %s204_s7 }
  0x1d   :  { %p211_p0 = por %p210_p13, %p209_p12 }
  0x1f   :  { %p212_p1 = pnand %p211_p0, %p205_p11 }
  0x21   :  { %215 = shalt.err (!%p212_p1)
}
  0x22   :  { %s268_s1 = smov 128   ;;  %s269_s8 = smov 8  }
  0x23   :  { %22 = dma.hbm_to_vmem [thread:$0]  %s371_s0, 2048, %s292_s15, [#allocation3], %s268_s1, %s268_s1, %s269_s8  }
  0x24   :  { %s270_s11 = smov [#allocation7]   ;;  %s216_s16 = scalar_lea.hbm %s373_s2, 16 }
  0x25   :  { %s39_s12 = sshll.u32 %s270_s11, 4  ;;  %p217_p2 = scmp.ne.s32.totalorder %s373_s2, %s216_s16  ;;  %s40_s12 = int_to_ptr.vmem [resolvable:$true] %s39_s12 }
  0x26   :  { %p220_p3 = scmp.lt.u32.totalorder %s216_s16, %s373_s2 }
  0x28   :  { %p222_p4 = pnand %p220_p3, %p217_p2 }
  0x2a   :  { %225 = shalt.err (!%p222_p4)
}
  0x2b   :  { %s226_s21 = scalar_lea.vmem %s40_s12, 16  ;;  %s230_s0 = scalar_lea.vmem %s40_s12, 32 }
  0x2c   :  { %p227_p5 = scmp.ne.s32.totalorder %s40_s12, %s226_s21  ;;  %p231_p6 = scmp.lt.s32.totalorder %s40_s12, %s40_s12 }
  0x2d   :  { %p232_p7 = scmp.lt.s32.totalorder %s230_s0, %s226_s21 }
  0x2f   :  { %p233_p8 = por %p232_p7, %p231_p6 }
  0x31   :  { %p234_p9 = pnand %p233_p8, %p227_p5 }
  0x33   :  { %237 = shalt.err (!%p234_p9)
}
  0x34   :  { %42 = dma.hbm_to_vmem [thread:$0]  %s373_s2, 16, %s40_s12, [#allocation6]  }
  0x35   :  { %260 = dma.done.wait [#allocation3], 2048  }
  0x36   :  { %261 = vsyncadd [#allocation3], 4294965248 }
  0x37   :  { %262 = dma.done.wait [#allocation6], 32  }
  0x38   :  { %263 = vsyncadd [#allocation6], 4294967264  ;;  %v52_v0 = vld [vmem:[#allocation2] sm:$0xff]  ;;  %v53_v4 = vld [vmem:[#allocation2 + $0x8] sm:$0xff]  ;;  %s271_s2 = smov [#allocation8]  }
  0x39   :  { %v164_v1 = vld [vmem:[#allocation5] ss:$0 sm:$0xff]  ;;  %v338_v2 = vld [vmem:[#allocation7] ss:$0 sm:$0xff]  ;;  %v54_v5 = vld [vmem:[#allocation2 + $0x10] sm:$0xff]  ;;  %s151_s23 = sshll.u32 %s271_s2, 4  ;;  %s152_s23 = int_to_ptr.vmem [resolvable:$true] %s151_s23 }
  0x3a   :  { %v75_v3 = vmul.f32 %v164_v1, %v52_v0  ;;  %v55_v6 = vld [vmem:[#allocation2 + $0x18] sm:$0xff]  ;;  %v76_v7 = vmul.f32 %v164_v1, %v53_v4  ;;  %v77_v8 = vmul.f32 %v164_v1, %v54_v5  ;;  %v56_v10 = vld [vmem:[#allocation2 + $0x20] sm:$0xff]  ;;  %v57_v11 = vld [vmem:[#allocation2 + $0x28] sm:$0xff]  ;;  %s238_s24 = scalar_lea.vmem %s152_s23, 2048  ;;  %p243_p11 = scmp.lt.s32.totalorder %s152_s23, %s152_s23 }
  0x3b   :  { %v78_v9 = vmul.f32 %v164_v1, %v55_v6  ;;  %v58_v12 = vld [vmem:[#allocation2 + $0x30] sm:$0xff]  ;;  %v79_v14 = vmul.f32 %v164_v1, %v56_v10  ;;  %v80_v15 = vmul.f32 %v164_v1, %v57_v11  ;;  %v59_v17 = vld [vmem:[#allocation2 + $0x38] sm:$0xff]  ;;  %v60_v22 = vld [vmem:[#allocation2 + $0x40] sm:$0xff]  ;;  %p239_p10 = scmp.ne.s32.totalorder %s152_s23, %s238_s24  ;;  %p244_p12 = scmp.lt.s32.totalorder %s238_s24, %s238_s24 }
  0x3c   :  { %v98_v13 = vadd.f32 %v338_v2, %v75_v3  ;;  %v81_v16 = vmul.f32 %v164_v1, %v58_v12  ;;  %v99_v18 = vadd.f32 %v338_v2, %v76_v7  ;;  %v100_v19 = vadd.f32 %v338_v2, %v77_v8  ;;  %v61_v27 = vld [vmem:[#allocation2 + $0x48] sm:$0xff]  ;;  %v62_v28 = vld [vmem:[#allocation2 + $0x50] sm:$0xff]  ;;  %v63_v29 = vld [vmem:[#allocation2 + $0x58] sm:$0xff] }
  0x3d   :  { %v101_v20 = vadd.f32 %v338_v2, %v78_v9  ;;  %v82_v21 = vmul.f32 %v164_v1, %v59_v17  ;;  %v102_v24 = vadd.f32 %v338_v2, %v79_v14  ;;  %v103_v25 = vadd.f32 %v338_v2, %v80_v15  ;;  %v64_v34 = vld [vmem:[#allocation2 + $0x60] sm:$0xff]  ;;  %v65_v35 = vld [vmem:[#allocation2 + $0x68] sm:$0xff]  ;;  %v66_v36 = vld [vmem:[#allocation2 + $0x70] sm:$0xff]  ;;  %p245_p13 = por %p244_p12, %p243_p11 }
  0x3e   :  { %v114_v23 = vmax.f32 %v98_v13, 0.0  ;;  %v104_v26 = vadd.f32 %v338_v2, %v81_v16  ;;  %v115_v30 = vmax.f32 %v99_v18, 0.0  ;;  %v116_v31 = vmax.f32 %v100_v19, 0.0  ;;  %v67_v41 = vld [vmem:[#allocation2 + $0x78] sm:$0xff] }
  0x3f   :  { %v117_v32 = vmax.f32 %v101_v20, 0.0  ;;  %v105_v33 = vadd.f32 %v338_v2, %v82_v21  ;;  %v118_v37 = vmax.f32 %v102_v24, 0.0  ;;  %v119_v38 = vmax.f32 %v103_v25, 0.0  ;;  %p246_p0 = pnand %p245_p13, %p239_p10 }
  0x40   :  { %130 = vst [vmem:[#allocation8] sm:$0xff] %v114_v23  ;;  %v120_v39 = vmax.f32 %v104_v26, 0.0  ;;  %v83_v40 = vmul.f32 %v164_v1, %v60_v22  ;;  %131 = vst [vmem:[#allocation8 + $0x8] sm:$0xff] %v115_v30  ;;  %v84_v43 = vmul.f32 %v164_v1, %v61_v27  ;;  %v85_v44 = vmul.f32 %v164_v1, %v62_v28 }
  0x41   :  { %132 = vst [vmem:[#allocation8 + $0x10] sm:$0xff] %v116_v31  ;;  %133 = vst [vmem:[#allocation8 + $0x18] sm:$0xff] %v117_v32  ;;  %v121_v42 = vmax.f32 %v105_v33, 0.0  ;;  %v86_v45 = vmul.f32 %v164_v1, %v63_v29  ;;  %v87_v47 = vmul.f32 %v164_v1, %v64_v34  ;;  %v88_v48 = vmul.f32 %v164_v1, %v65_v35 }
  0x42   :  { %134 = vst [vmem:[#allocation8 + $0x20] sm:$0xff] %v118_v37  ;;  %135 = vst [vmem:[#allocation8 + $0x28] sm:$0xff] %v119_v38  ;;  %v106_v46 = vadd.f32 %v338_v2, %v83_v40  ;;  %v89_v49 = vmul.f32 %v164_v1, %v66_v36  ;;  %v107_v50 = vadd.f32 %v338_v2, %v84_v43 }
  0x43   :  { %136 = vst [vmem:[#allocation8 + $0x30] sm:$0xff] %v120_v39  ;;  %137 = vst [vmem:[#allocation8 + $0x38] sm:$0xff] %v121_v42  ;;  %v108_v51 = vadd.f32 %v338_v2, %v85_v44  ;;  %v109_v52 = vadd.f32 %v338_v2, %v86_v45  ;;  %v90_v53 = vmul.f32 %v164_v1, %v67_v41 }
  0x44   :  { %v122_v54 = vmax.f32 %v106_v46, 0.0  ;;  %v110_v55 = vadd.f32 %v338_v2, %v87_v47  ;;  %v111_v56 = vadd.f32 %v338_v2, %v88_v48  ;;  %v112_v57 = vadd.f32 %v338_v2, %v89_v49 }
  0x45   :  { %v123_v58 = vmax.f32 %v107_v50, 0.0  ;;  %v124_v59 = vmax.f32 %v108_v51, 0.0  ;;  %v125_v60 = vmax.f32 %v109_v52, 0.0  ;;  %v113_v61 = vadd.f32 %v338_v2, %v90_v53 }
  0x46   :  { %138 = vst [vmem:[#allocation8 + $0x40] sm:$0xff] %v122_v54  ;;  %v126_v62 = vmax.f32 %v110_v55, 0.0  ;;  %v127_v63 = vmax.f32 %v111_v56, 0.0  ;;  %v128_v0 = vmax.f32 %v112_v57, 0.0 }
  0x47   :  { %139 = vst [vmem:[#allocation8 + $0x48] sm:$0xff] %v123_v58  ;;  %140 = vst [vmem:[#allocation8 + $0x50] sm:$0xff] %v124_v59  ;;  %v129_v1 = vmax.f32 %v113_v61, 0.0 }
  0x48   :  { %141 = vst [vmem:[#allocation8 + $0x58] sm:$0xff] %v125_v60  ;;  %142 = vst [vmem:[#allocation8 + $0x60] sm:$0xff] %v126_v62 }
  0x49   :  { %143 = vst [vmem:[#allocation8 + $0x68] sm:$0xff] %v127_v63  ;;  %144 = vst [vmem:[#allocation8 + $0x70] sm:$0xff] %v128_v0 }
  0x4a   :  { %145 = vst [vmem:[#allocation8 + $0x78] sm:$0xff] %v129_v1 }
  0x4b   :  { %249 = shalt.err (!%p246_p0)
}
  0x4c   :  { %s250_s27 = scalar_lea.hbm %s374_s3, 2048 }
  0x4d   :  { %p251_p1 = scmp.ne.s32.totalorder %s374_s3, %s250_s27  ;;  %p254_p2 = scmp.lt.u32.totalorder %s250_s27, %s374_s3 }
  0x4f   :  { %p256_p3 = pnand %p254_p2, %p251_p1 }
  0x51   :  { %259 = shalt.err (!%p256_p3)
}
  0x52   :  { %157 = dma.vmem_to_hbm [thread:$0]  %s152_s23, 2048, %s374_s3, [#allocation4], %s268_s1, %s268_s1, %s269_s8  }
  0x53   :  { %264 = dma.done.wait [#allocation4], 2048  }
  0x54   :  { %265 = vsyncadd [#allocation4], 4294965248 }
  0x55   :  { %161 = vsyncpa [#allocation3], 1 }
  0x56   :  { %162 = vsyncpa [#allocation6], 1 }
  0x57   :  { %163 = vsyncpa [#allocation4], 1 }

</bundles_post_ra>
